<compile_context>
chip_gen: v7x
topology: tpu7x:2x2x1
jax: 0.10.0
libtpu: 0.0.40
codegen_flags: <defaults>
</compile_context>

<pallas_src>
import jax
import jax.numpy as jnp
from jax.experimental import pallas as pl
from jax.experimental.pallas import tpu as pltpu


# Weight-slab layout (feature-major, each [D, D], stored [out, in]):
#  0:w1 1:w2 2:w3 3:w4(pad rows)                  encoder
#  4:wm1(pad cols) 5:wm2                          HNN forward (tanh MLP)
#  6:(wm2*g2).T 7:pad_rows(M @ wm1.T)             HNN analytic backward (g2, M.T folded)
#  8:w5(pad cols) 9:w6 10:w7 11:w8                decoder
# Bias-slab layout ([D, 10], one column per bias):
#  0:b1 1:b2 2:b3 3:b4(pad) 4:bm1 5:bm2 6:b5 7:b6 8:b7 9:b8
def pixel_hnn_kernel(xT_ref, w_ref, b_ref, outT_ref):
    f32 = jnp.float32

    def lin(a, wi, bi):
        w = w_ref[wi]                                      # [out, in]
        return (jnp.dot(w, a.astype(w.dtype), preferred_element_type=f32)
                + b_ref[:, bi:bi + 1])                     # bias as [D, 1] column

    x = xT_ref[...]                                        # [D, TB] feature-major

    # ---- encode: h=relu(l1(x)); h+=relu(l2(h)); h+=relu(l3(h)); z=l4(h) ----
    h = jnp.maximum(lin(x, 0, 0), 0.0)
    h = h + jnp.maximum(lin(h, 1, 1), 0.0)
    h = h + jnp.maximum(lin(h, 2, 2), 0.0)
    z = lin(h, 3, 3)                                       # latent rows 0..L-1, rest 0

    # ---- HNN time_derivative (solenoidal field only) ----
    a1 = jnp.tanh(lin(z, 4, 4))
    a2 = jnp.tanh(lin(a1, 5, 5))
    # analytic grad of F2.sum() wrt z; g2 = wm3[1] folded into w[6], M.T into w[7]
    w6 = w_ref[6]
    gh2 = 1.0 - a2 * a2                                    # [H, TB]
    gh1 = (1.0 - a1 * a1) * jnp.dot(w6, gh2.astype(w6.dtype),
                                    preferred_element_type=f32)   # [H, TB]
    w7 = w_ref[7]
    sol = jnp.dot(w7, gh1.astype(w7.dtype), preferred_element_type=f32)  # [D, TB]
    zn = z + sol

    # ---- decode: h=relu(l5(zn)); h+=relu(l6(h)); h+=relu(l7(h)); out=l8(h) ----
    h = jnp.maximum(lin(zn, 8, 6), 0.0)
    h = h + jnp.maximum(lin(h, 9, 7), 0.0)
    h = h + jnp.maximum(lin(h, 10, 8), 0.0)
    outT_ref[...] = lin(h, 11, 9).astype(outT_ref.dtype)


def prep_params(params, weight_dtype=jnp.float32):
    """One-time parameter prep (call once, reuse every forward):
    keep weights un-transposed (feature-major kernel), pad the latent dim to D,
    fold g2 = wm3[1] and M.T into the analytic-backward weights, pack everything
    into one weight slab and one bias slab (3 DMAs per grid step total).
    For v6e/v7x throughput pass weight_dtype=jnp.bfloat16 (f32 accumulation is
    kept inside the kernel via preferred_element_type)."""
    (w1, b1, w2, b2, w3, b3, w4, b4,
     wm1, bm1, wm2, bm2, wm3,
     w5, b5, w6, b6, w7, b7, w8, b8, M) = params

    D = w1.shape[1]          # x_dim
    lat = w4.shape[0]        # latent dim
    # TODO(synk): real PixelHNN configs have x_dim >> hidden; there, pack
    # per-layer shapes (or split encoder/HNN/decoder slabs streamed over an
    # extra grid axis) instead of padding to a uniform [D, D] slab, and set
    # vmem_limit_bytes explicitly — a uniform slab would blow v7x's 64 MiB VMEM.
    assert w1.shape[0] == D and wm1.shape[0] == D and w8.shape[0] == D, \
        "slab packing assumes x_dim == ae_hidden == hnn_hidden"
    assert lat <= D

    def pad_rows(a):   # [r, c] -> [D, c]  (zero out-rows -> padded outputs are 0)
        return jnp.pad(a, ((0, D - a.shape[0]), (0, 0)))

    def pad_cols(a):   # [r, c] -> [r, D]  (zero in-cols -> padded inputs ignored)
        return jnp.pad(a, ((0, 0), (0, D - a.shape[1])))

    def pad_vec(v):    # [c] -> [D]
        return jnp.pad(v, (0, D - v.shape[0]))

    g2 = wm3[1, :]                          # output row selecting F2
    wm2_bwd = (wm2 * g2[:, None]).T         # grad_a1 = wm2_bwd @ (1 - a2^2)
    w_sol = pad_rows(M @ wm1.T)             # sol    = w_sol   @ gh1   (M.T folded)

    w_slab = jnp.stack([
        w1, w2, w3, pad_rows(w4),
        pad_cols(wm1), wm2,
        wm2_bwd, w_sol,
        pad_cols(w5), w6, w7, w8,
    ]).astype(weight_dtype)                               # [12, D, D]

    b_slab = jnp.stack([
        b1, b2, b3, pad_vec(b4),
        bm1, bm2,
        b5, b6, b7, b8,
    ], axis=1).astype(jnp.float32)                        # [D, 10] (feature-major)

    return w_slab, b_slab


def _round_up(a, m):
    return ((a + m - 1) // m) * m


def pixel_hnn_forward(x, w_slab, b_slab, *, block_b=512):
    """Batched-grid Pallas forward in a feature-major (batch-in-lanes) layout.
    Weights/biases stay VMEM-resident across the grid; the batch axis is
    'parallel' so v7x megacore shards tiles across both TensorCores."""
    B, D = x.shape
    n_w = w_slab.shape[0]
    n_b = b_slab.shape[1]

    # Lane-dense batch tiles (TB multiple of 128).
    Bp_min = _round_up(B, 128)
    TB = min(_round_up(block_b, 128), Bp_min)
    # Prefer >= 2 batch tiles when the batch allows it so v7x megacore can
    # shard across both TensorCores; the extra grid step is ~0.35us noise on
    # single-TC v5e/v6e.
    if Bp_min // TB < 2 and Bp_min >= 256:
        TB = _round_up(Bp_min // 2, 128)
    grid_b = pl.cdiv(Bp_min, TB)
    Bp = grid_b * TB

    xT = x.T                                               # [D, B] feature-major
    if Bp != B:
        xT = jnp.pad(xT, ((0, 0), (0, Bp - B)))

    # TODO(synk): at real pixel dims mark the two resident slabs with
    # pipeline_mode=pl.Buffered(1) to drop the redundant second pipeline buffer;
    # at D=32 the saving is a few tens of KiB so it is omitted here.
    outT = pl.pallas_call(
        pixel_hnn_kernel,
        out_shape=jax.ShapeDtypeStruct((D, Bp), jnp.float32),
        grid=(grid_b,),
        in_specs=[
            pl.BlockSpec((D, TB), lambda i: (0, i)),         # batch tile of x.T
            pl.BlockSpec((n_w, D, D), lambda i: (0, 0, 0)),  # weight slab (resident)
            pl.BlockSpec((D, n_b), lambda i: (0, 0)),        # bias slab   (resident)
        ],
        out_specs=pl.BlockSpec((D, TB), lambda i: (0, i)),
        compiler_params=pltpu.CompilerParams(
            dimension_semantics=("parallel",)),
    )(xT, w_slab, b_slab)

    out = outT.T                                           # back to [Bp, D]
    return out[:B] if Bp != B else out


def pixel_hnn_reference(x, params):
    """Plain-JAX reference of the same forward pass (for correctness check)."""
    (w1, b1, w2, b2, w3, b3, w4, b4,
     wm1, bm1, wm2, bm2, wm3,
     w5, b5, w6, b6, w7, b7, w8, b8, M) = params

    h = jax.nn.relu(x @ w1.T + b1)
    h = h + jax.nn.relu(h @ w2.T + b2)
    h = h + jax.nn.relu(h @ w3.T + b3)
    z = h @ w4.T + b4

    def F2(zz):
        a1 = jnp.tanh(zz @ wm1.T + bm1)
        a2 = jnp.tanh(a1 @ wm2.T + bm2)
        return (a2 @ wm3.T)[:, 1].sum()

    dF2 = jax.grad(F2)(z)
    zn = z + dF2 @ M.T

    h = jax.nn.relu(zn @ w5.T + b5)
    h = h + jax.nn.relu(h @ w6.T + b6)
    h = h + jax.nn.relu(h @ w7.T + b7)
    return h @ w8.T + b8


def permutation_tensor(n):
    # canonical coords: M = cat([I[n//2:], -I[:n//2]])  ==  [[0, I], [-I, 0]]
    eye = jnp.eye(n, dtype=jnp.float32)
    return jnp.concatenate([eye[n // 2:], -eye[: n // 2]], axis=0)


def make_params(key, x_dim, ae_hidden, latent_dim, hnn_hidden):
    ks = jax.random.split(key, 21)

    def lin_p(kw, kb, out_d, in_d):
        bound = 1.0 / jnp.sqrt(in_d)
        w = jax.random.uniform(kw, (out_d, in_d), jnp.float32, -bound, bound)
        b = jax.random.uniform(kb, (out_d,), jnp.float32, -bound, bound)
        return w, b

    # MLPAutoencoder (relu): encoder l1..l4, decoder l5..l8
    w1, b1 = lin_p(ks[0], ks[1], ae_hidden, x_dim)
    w2, b2 = lin_p(ks[2], ks[3], ae_hidden, ae_hidden)
    w3, b3 = lin_p(ks[4], ks[5], ae_hidden, ae_hidden)
    w4, b4 = lin_p(ks[6], ks[7], latent_dim, ae_hidden)
    w5, b5 = lin_p(ks[8], ks[9], ae_hidden, latent_dim)
    w6, b6 = lin_p(ks[10], ks[11], ae_hidden, ae_hidden)
    w7, b7 = lin_p(ks[12], ks[13], ae_hidden, ae_hidden)
    w8, b8 = lin_p(ks[14], ks[15], x_dim, ae_hidden)
    # HNN MLP (tanh): l1, l2 with bias, l3 without bias, output_dim = 2
    wm1, bm1 = lin_p(ks[16], ks[17], hnn_hidden, latent_dim)
    wm2, bm2 = lin_p(ks[18], ks[19], hnn_hidden, hnn_hidden)
    bound3 = 1.0 / jnp.sqrt(hnn_hidden)
    wm3 = jax.random.uniform(ks[20], (2, hnn_hidden), jnp.float32, -bound3, bound3)

    M = permutation_tensor(latent_dim)
    return (w1, b1, w2, b2, w3, b3, w4, b4,
            wm1, bm1, wm2, bm2, wm3,
            w5, b5, w6, b6, w7, b7, w8, b8, M)


if __name__ == "__main__":
    # Small model dims per the module; batch chosen so the lane-dense batch
    # tiling yields two 128-lane tiles -> grid=(2,), "parallel" over both TCs
    # on v7x, one tile per step elsewhere.
    batch, x_dim, ae_hidden, latent_dim, hnn_hidden = 256, 32, 32, 4, 32

    key = jax.random.PRNGKey(0)
    k_x, k_p = jax.random.split(key)
    x = jax.random.normal(k_x, (batch, x_dim), jnp.float32)
    params = make_params(k_p, x_dim, ae_hidden, latent_dim, hnn_hidden)

    # One-time param prep (hoisted out of the per-call path).
    # For v6e/v7x throughput at real pixel sizes use weight_dtype=jnp.bfloat16
    # (and loosen the tolerance below); demo keeps f32 for the exact check.
    w_slab, b_slab = prep_params(params, weight_dtype=jnp.float32)

    out = pixel_hnn_forward(x, w_slab, b_slab, block_b=512)
    out = jax.block_until_ready(out)

    ref = pixel_hnn_reference(x, params)
    assert out.shape == (batch, x_dim)
    assert jnp.allclose(out, ref, atol=1e-4, rtol=1e-4), "mismatch vs reference"

    print("KERNEL_OK")
</pallas_src>

<mosaic_0001>
module attributes {stable_mosaic.version = 11 : i64} {
  func.func @pixel_hnn_kernel(%arg0: i32, %arg1: memref<32x128xf32, #tpu.memory_space<vmem>>, %arg2: memref<12x32x32xf32, #tpu.memory_space<vmem>>, %arg3: memref<32x10xf32, #tpu.memory_space<vmem>>, %arg4: memref<32x128xf32, #tpu.memory_space<vmem>>) attributes {dimension_semantics = [#tpu.dimension_semantics<parallel>], iteration_bounds = array<i64: 2>, scalar_prefetch = 0 : i64, scratch_operands = 0 : i64, tpu.core_type = #tpu.core_type<tc>, window_params = [{transform_indices = @transform_0, window_bounds = array<i64: 32, 128>}, {pipeline_mode = #tpu.pipeline_mode<synchronous>, transform_indices = @transform_1, window_bounds = array<i64: 12, 32, 32>}, {pipeline_mode = #tpu.pipeline_mode<synchronous>, transform_indices = @transform_2, window_bounds = array<i64: 32, 10>}, {transform_indices = @transform_3, window_bounds = array<i64: 32, 128>}]} {
    %c0 = arith.constant 0 : index
    %c0_0 = arith.constant 0 : index
    %0 = vector.load %arg1[%c0, %c0_0] : memref<32x128xf32, #tpu.memory_space<vmem>>, vector<32x128xf32>
    %c0_1 = arith.constant 0 : index
    %c0_2 = arith.constant 0 : index
    %c0_3 = arith.constant 0 : index
    %1 = vector.load %arg2[%c0_1, %c0_2, %c0_3] : memref<12x32x32xf32, #tpu.memory_space<vmem>>, vector<1x32x32xf32>
    %2 = vector.shape_cast %1 : vector<1x32x32xf32> to vector<32x32xf32>
    %cst = arith.constant dense<0.000000e+00> : vector<32x128xf32>
    %3 = tpu.matmul %2, %0, %cst {dimension_numbers = #tpu.dot_dimension_numbers<[1], [0], [0], [1], [0, 0, 1, 1], [], []>} : vector<32x32xf32>, vector<32x128xf32>, vector<32x128xf32> -> vector<32x128xf32>
    %c0_4 = arith.constant 0 : index
    %c0_5 = arith.constant 0 : index
    %4 = vector.load %arg3[%c0_4, %c0_5] : memref<32x10xf32, #tpu.memory_space<vmem>>, vector<32x1xf32>
    %5 = vector.broadcast %4 : vector<32x1xf32> to vector<32x128xf32>
    %6 = arith.addf %3, %5 : vector<32x128xf32>
    %cst_6 = arith.constant 0.000000e+00 : f32
    %7 = vector.broadcast %cst_6 : f32 to vector<32x128xf32>
    %8 = arith.maximumf %6, %7 : vector<32x128xf32>
    %c1 = arith.constant 1 : index
    %c0_7 = arith.constant 0 : index
    %c0_8 = arith.constant 0 : index
    %9 = vector.load %arg2[%c1, %c0_7, %c0_8] : memref<12x32x32xf32, #tpu.memory_space<vmem>>, vector<1x32x32xf32>
    %10 = vector.shape_cast %9 : vector<1x32x32xf32> to vector<32x32xf32>
    %cst_9 = arith.constant dense<0.000000e+00> : vector<32x128xf32>
    %11 = tpu.matmul %10, %8, %cst_9 {dimension_numbers = #tpu.dot_dimension_numbers<[1], [0], [0], [1], [0, 0, 1, 1], [], []>} : vector<32x32xf32>, vector<32x128xf32>, vector<32x128xf32> -> vector<32x128xf32>
    %c0_10 = arith.constant 0 : index
    %c1_11 = arith.constant 1 : index
    %12 = vector.load %arg3[%c0_10, %c1_11] : memref<32x10xf32, #tpu.memory_space<vmem>>, vector<32x1xf32>
    %13 = vector.broadcast %12 : vector<32x1xf32> to vector<32x128xf32>
    %14 = arith.addf %11, %13 : vector<32x128xf32>
    %cst_12 = arith.constant 0.000000e+00 : f32
    %15 = vector.broadcast %cst_12 : f32 to vector<32x128xf32>
    %16 = arith.maximumf %14, %15 : vector<32x128xf32>
    %17 = arith.addf %8, %16 : vector<32x128xf32>
    %c2 = arith.constant 2 : index
    %c0_13 = arith.constant 0 : index
    %c0_14 = arith.constant 0 : index
    %18 = vector.load %arg2[%c2, %c0_13, %c0_14] : memref<12x32x32xf32, #tpu.memory_space<vmem>>, vector<1x32x32xf32>
    %19 = vector.shape_cast %18 : vector<1x32x32xf32> to vector<32x32xf32>
    %cst_15 = arith.constant dense<0.000000e+00> : vector<32x128xf32>
    %20 = tpu.matmul %19, %17, %cst_15 {dimension_numbers = #tpu.dot_dimension_numbers<[1], [0], [0], [1], [0, 0, 1, 1], [], []>} : vector<32x32xf32>, vector<32x128xf32>, vector<32x128xf32> -> vector<32x128xf32>
    %c0_16 = arith.constant 0 : index
    %c2_17 = arith.constant 2 : index
    %21 = vector.load %arg3[%c0_16, %c2_17] : memref<32x10xf32, #tpu.memory_space<vmem>>, vector<32x1xf32>
    %22 = vector.broadcast %21 : vector<32x1xf32> to vector<32x128xf32>
    %23 = arith.addf %20, %22 : vector<32x128xf32>
    %cst_18 = arith.constant 0.000000e+00 : f32
    %24 = vector.broadcast %cst_18 : f32 to vector<32x128xf32>
    %25 = arith.maximumf %23, %24 : vector<32x128xf32>
    %26 = arith.addf %17, %25 : vector<32x128xf32>
    %c3 = arith.constant 3 : index
    %c0_19 = arith.constant 0 : index
    %c0_20 = arith.constant 0 : index
    %27 = vector.load %arg2[%c3, %c0_19, %c0_20] : memref<12x32x32xf32, #tpu.memory_space<vmem>>, vector<1x32x32xf32>
    %28 = vector.shape_cast %27 : vector<1x32x32xf32> to vector<32x32xf32>
    %cst_21 = arith.constant dense<0.000000e+00> : vector<32x128xf32>
    %29 = tpu.matmul %28, %26, %cst_21 {dimension_numbers = #tpu.dot_dimension_numbers<[1], [0], [0], [1], [0, 0, 1, 1], [], []>} : vector<32x32xf32>, vector<32x128xf32>, vector<32x128xf32> -> vector<32x128xf32>
    %c0_22 = arith.constant 0 : index
    %c3_23 = arith.constant 3 : index
    %30 = vector.load %arg3[%c0_22, %c3_23] : memref<32x10xf32, #tpu.memory_space<vmem>>, vector<32x1xf32>
    %31 = vector.broadcast %30 : vector<32x1xf32> to vector<32x128xf32>
    %32 = arith.addf %29, %31 : vector<32x128xf32>
    %c4 = arith.constant 4 : index
    %c0_24 = arith.constant 0 : index
    %c0_25 = arith.constant 0 : index
    %33 = vector.load %arg2[%c4, %c0_24, %c0_25] : memref<12x32x32xf32, #tpu.memory_space<vmem>>, vector<1x32x32xf32>
    %34 = vector.shape_cast %33 : vector<1x32x32xf32> to vector<32x32xf32>
    %cst_26 = arith.constant dense<0.000000e+00> : vector<32x128xf32>
    %35 = tpu.matmul %34, %32, %cst_26 {dimension_numbers = #tpu.dot_dimension_numbers<[1], [0], [0], [1], [0, 0, 1, 1], [], []>} : vector<32x32xf32>, vector<32x128xf32>, vector<32x128xf32> -> vector<32x128xf32>
    %c0_27 = arith.constant 0 : index
    %c4_28 = arith.constant 4 : index
    %36 = vector.load %arg3[%c0_27, %c4_28] : memref<32x10xf32, #tpu.memory_space<vmem>>, vector<32x1xf32>
    %37 = vector.broadcast %36 : vector<32x1xf32> to vector<32x128xf32>
    %38 = arith.addf %35, %37 : vector<32x128xf32>
    %39 = math.tanh %38 : vector<32x128xf32>
    %c5 = arith.constant 5 : index
    %c0_29 = arith.constant 0 : index
    %c0_30 = arith.constant 0 : index
    %40 = vector.load %arg2[%c5, %c0_29, %c0_30] : memref<12x32x32xf32, #tpu.memory_space<vmem>>, vector<1x32x32xf32>
    %41 = vector.shape_cast %40 : vector<1x32x32xf32> to vector<32x32xf32>
    %cst_31 = arith.constant dense<0.000000e+00> : vector<32x128xf32>
    %42 = tpu.matmul %41, %39, %cst_31 {dimension_numbers = #tpu.dot_dimension_numbers<[1], [0], [0], [1], [0, 0, 1, 1], [], []>} : vector<32x32xf32>, vector<32x128xf32>, vector<32x128xf32> -> vector<32x128xf32>
    %c0_32 = arith.constant 0 : index
    %c5_33 = arith.constant 5 : index
    %43 = vector.load %arg3[%c0_32, %c5_33] : memref<32x10xf32, #tpu.memory_space<vmem>>, vector<32x1xf32>
    %44 = vector.broadcast %43 : vector<32x1xf32> to vector<32x128xf32>
    %45 = arith.addf %42, %44 : vector<32x128xf32>
    %46 = math.tanh %45 : vector<32x128xf32>
    %c6 = arith.constant 6 : index
    %c0_34 = arith.constant 0 : index
    %c0_35 = arith.constant 0 : index
    %47 = vector.load %arg2[%c6, %c0_34, %c0_35] : memref<12x32x32xf32, #tpu.memory_space<vmem>>, vector<1x32x32xf32>
    %48 = vector.shape_cast %47 : vector<1x32x32xf32> to vector<32x32xf32>
    %49 = arith.mulf %46, %46 : vector<32x128xf32>
    %cst_36 = arith.constant 1.000000e+00 : f32
    %50 = vector.broadcast %cst_36 : f32 to vector<32x128xf32>
    %51 = arith.subf %50, %49 : vector<32x128xf32>
    %52 = arith.mulf %39, %39 : vector<32x128xf32>
    %cst_37 = arith.constant 1.000000e+00 : f32
    %53 = vector.broadcast %cst_37 : f32 to vector<32x128xf32>
    %54 = arith.subf %53, %52 : vector<32x128xf32>
    %cst_38 = arith.constant dense<0.000000e+00> : vector<32x128xf32>
    %55 = tpu.matmul %48, %51, %cst_38 {dimension_numbers = #tpu.dot_dimension_numbers<[1], [0], [0], [1], [0, 0, 1, 1], [], []>} : vector<32x32xf32>, vector<32x128xf32>, vector<32x128xf32> -> vector<32x128xf32>
    %56 = arith.mulf %54, %55 : vector<32x128xf32>
    %c7 = arith.constant 7 : index
    %c0_39 = arith.constant 0 : index
    %c0_40 = arith.constant 0 : index
    %57 = vector.load %arg2[%c7, %c0_39, %c0_40] : memref<12x32x32xf32, #tpu.memory_space<vmem>>, vector<1x32x32xf32>
    %58 = vector.shape_cast %57 : vector<1x32x32xf32> to vector<32x32xf32>
    %cst_41 = arith.constant dense<0.000000e+00> : vector<32x128xf32>
    %59 = tpu.matmul %58, %56, %cst_41 {dimension_numbers = #tpu.dot_dimension_numbers<[1], [0], [0], [1], [0, 0, 1, 1], [], []>} : vector<32x32xf32>, vector<32x128xf32>, vector<32x128xf32> -> vector<32x128xf32>
    %60 = arith.addf %32, %59 : vector<32x128xf32>
    %c8 = arith.constant 8 : index
    %c0_42 = arith.constant 0 : index
    %c0_43 = arith.constant 0 : index
    %61 = vector.load %arg2[%c8, %c0_42, %c0_43] : memref<12x32x32xf32, #tpu.memory_space<vmem>>, vector<1x32x32xf32>
    %62 = vector.shape_cast %61 : vector<1x32x32xf32> to vector<32x32xf32>
    %cst_44 = arith.constant dense<0.000000e+00> : vector<32x128xf32>
    %63 = tpu.matmul %62, %60, %cst_44 {dimension_numbers = #tpu.dot_dimension_numbers<[1], [0], [0], [1], [0, 0, 1, 1], [], []>} : vector<32x32xf32>, vector<32x128xf32>, vector<32x128xf32> -> vector<32x128xf32>
    %c0_45 = arith.constant 0 : index
    %c6_46 = arith.constant 6 : index
    %64 = vector.load %arg3[%c0_45, %c6_46] : memref<32x10xf32, #tpu.memory_space<vmem>>, vector<32x1xf32>
    %65 = vector.broadcast %64 : vector<32x1xf32> to vector<32x128xf32>
    %66 = arith.addf %63, %65 : vector<32x128xf32>
    %cst_47 = arith.constant 0.000000e+00 : f32
    %67 = vector.broadcast %cst_47 : f32 to vector<32x128xf32>
    %68 = arith.maximumf %66, %67 : vector<32x128xf32>
    %c9 = arith.constant 9 : index
    %c0_48 = arith.constant 0 : index
    %c0_49 = arith.constant 0 : index
    %69 = vector.load %arg2[%c9, %c0_48, %c0_49] : memref<12x32x32xf32, #tpu.memory_space<vmem>>, vector<1x32x32xf32>
    %70 = vector.shape_cast %69 : vector<1x32x32xf32> to vector<32x32xf32>
    %cst_50 = arith.constant dense<0.000000e+00> : vector<32x128xf32>
    %71 = tpu.matmul %70, %68, %cst_50 {dimension_numbers = #tpu.dot_dimension_numbers<[1], [0], [0], [1], [0, 0, 1, 1], [], []>} : vector<32x32xf32>, vector<32x128xf32>, vector<32x128xf32> -> vector<32x128xf32>
    %c0_51 = arith.constant 0 : index
    %c7_52 = arith.constant 7 : index
    %72 = vector.load %arg3[%c0_51, %c7_52] : memref<32x10xf32, #tpu.memory_space<vmem>>, vector<32x1xf32>
    %73 = vector.broadcast %72 : vector<32x1xf32> to vector<32x128xf32>
    %74 = arith.addf %71, %73 : vector<32x128xf32>
    %cst_53 = arith.constant 0.000000e+00 : f32
    %75 = vector.broadcast %cst_53 : f32 to vector<32x128xf32>
    %76 = arith.maximumf %74, %75 : vector<32x128xf32>
    %77 = arith.addf %68, %76 : vector<32x128xf32>
    %c10 = arith.constant 10 : index
    %c0_54 = arith.constant 0 : index
    %c0_55 = arith.constant 0 : index
    %78 = vector.load %arg2[%c10, %c0_54, %c0_55] : memref<12x32x32xf32, #tpu.memory_space<vmem>>, vector<1x32x32xf32>
    %79 = vector.shape_cast %78 : vector<1x32x32xf32> to vector<32x32xf32>
    %cst_56 = arith.constant dense<0.000000e+00> : vector<32x128xf32>
    %80 = tpu.matmul %79, %77, %cst_56 {dimension_numbers = #tpu.dot_dimension_numbers<[1], [0], [0], [1], [0, 0, 1, 1], [], []>} : vector<32x32xf32>, vector<32x128xf32>, vector<32x128xf32> -> vector<32x128xf32>
    %c0_57 = arith.constant 0 : index
    %c8_58 = arith.constant 8 : index
    %81 = vector.load %arg3[%c0_57, %c8_58] : memref<32x10xf32, #tpu.memory_space<vmem>>, vector<32x1xf32>
    %82 = vector.broadcast %81 : vector<32x1xf32> to vector<32x128xf32>
    %83 = arith.addf %80, %82 : vector<32x128xf32>
    %cst_59 = arith.constant 0.000000e+00 : f32
    %84 = vector.broadcast %cst_59 : f32 to vector<32x128xf32>
    %85 = arith.maximumf %83, %84 : vector<32x128xf32>
    %86 = arith.addf %77, %85 : vector<32x128xf32>
    %c11 = arith.constant 11 : index
    %c0_60 = arith.constant 0 : index
    %c0_61 = arith.constant 0 : index
    %87 = vector.load %arg2[%c11, %c0_60, %c0_61] : memref<12x32x32xf32, #tpu.memory_space<vmem>>, vector<1x32x32xf32>
    %88 = vector.shape_cast %87 : vector<1x32x32xf32> to vector<32x32xf32>
    %cst_62 = arith.constant dense<0.000000e+00> : vector<32x128xf32>
    %89 = tpu.matmul %88, %86, %cst_62 {dimension_numbers = #tpu.dot_dimension_numbers<[1], [0], [0], [1], [0, 0, 1, 1], [], []>} : vector<32x32xf32>, vector<32x128xf32>, vector<32x128xf32> -> vector<32x128xf32>
    %c0_63 = arith.constant 0 : index
    %c9_64 = arith.constant 9 : index
    %90 = vector.load %arg3[%c0_63, %c9_64] : memref<32x10xf32, #tpu.memory_space<vmem>>, vector<32x1xf32>
    %91 = vector.broadcast %90 : vector<32x1xf32> to vector<32x128xf32>
    %92 = arith.addf %89, %91 : vector<32x128xf32>
    %c0_65 = arith.constant 0 : index
    %c0_66 = arith.constant 0 : index
    %93 = vector.load %arg4[%c0_65, %c0_66] : memref<32x128xf32, #tpu.memory_space<vmem>>, vector<32x128xf32>
    tpu.vector_store %arg4[%c0_65, %c0_66], %92 {strides = array<i32>} : memref<32x128xf32, #tpu.memory_space<vmem>>, vector<32x128xf32>,
    return
  }
  func.func @transform_0(%arg0: i32) -> (i32, i32) {
    %c0_i32 = arith.constant 0 : i32
    %c0_i32_0 = arith.constant 0 : i32
    return %c0_i32, %arg0 : i32, i32
  }
  func.func @transform_1(%arg0: i32) -> (i32, i32, i32) {
    %c0_i32 = arith.constant 0 : i32
    %c0_i32_0 = arith.constant 0 : i32
    %c0_i32_1 = arith.constant 0 : i32
    %c0_i32_2 = arith.constant 0 : i32
    return %c0_i32, %c0_i32_0, %c0_i32_1 : i32, i32, i32
  }
  func.func @transform_2(%arg0: i32) -> (i32, i32) {
    %c0_i32 = arith.constant 0 : i32
    %c0_i32_0 = arith.constant 0 : i32
    %c0_i32_1 = arith.constant 0 : i32
    return %c0_i32, %c0_i32_0 : i32, i32
  }
  func.func @transform_3(%arg0: i32) -> (i32, i32) {
    %c0_i32 = arith.constant 0 : i32
    %c0_i32_0 = arith.constant 0 : i32
    return %c0_i32, %arg0 : i32, i32
  }
}

</mosaic_0001>

<bundles_post_ra>
// kernel: tpu_custom_call.1
= control target key start
LH: loop header
LB: loop body
LE: loop exit
PB: predicated region body
PF: predicated region fallthrough
CT: control target
= control target key end

     0   :  { %8 = vsyncpa [#allocation3], 0  ;;  %s2804_s0 = inlined_call_operand.hbm [shape: f32[32,256], index: 0, kind: input, shape index: {}]   ;;  %s2805_s1 = inlined_call_operand.hbm [shape: f32[12,32,32], index: 1, kind: input, shape index: {}]   ;;  %s2806_s2 = inlined_call_operand.vmem [shape: f32[32,10], index: 2, kind: input, shape index: {}]   ;;  %s2807_s3 = inlined_call_operand.hbm [shape: f32[32,256], index: 3, kind: output, shape index: {}]  }
   0x1   :  { %10 = vsyncpa [#allocation3 + $0x1], 0 }
   0x2   :  { %11 = vsyncpa [#allocation6], 0 }
   0x3   :  { %12 = vsyncpa [#allocation4], 0 }
   0x4   :  { %14 = vsyncpa [#allocation4 + $0x1], 0  ;;  %s2471_s12 = smov 0   ;;  %s2473_s13 = smov 0  }
   0x5   :  { %s2475_s14 = smov 0   ;;  %s2477_s15 = smov 0  }
   0x6 LB: > { %s2492_s16 = sadd.s32 4294967295, %s2430_s15   ;;  %s1771_s17 = sadd.s32 4294967294, %s2430_s15   ;;  %s2430_s15 = sphi %s2477_s15, %s2831_s15   ;;  %s2426_s14 = sphi %s2475_s14, %s2830_s14   ;;  %s2422_s13 = sphi %s2473_s13, %s2829_s13   ;;  %s2418_s12 = sphi %s2471_s12, %s2828_s12  }
   0x7   : > { %s2496_s18 = sadd.s32 1, %s2430_s15   ;;  %s27_s19 = sadd.s32 1, %s2426_s14 }
   0x8   : > { %s24_s20 = ssub.s32 %s2430_s15, %s2496_s18  ;;  %p34_p0 = scmp.ne.s32.totalorder %s2426_s14, %s2422_s13 }
   0x9   : > { %p25_p1 = scmp.eq.s32.totalorder %s24_s20, 0  ;;  %p35_p2 = scmp.eq.s32.totalorder %s2430_s15, 0 }
   0xa   : > { %p40_p3 = scmp.ne.s32.totalorder %s2422_s13, %s2418_s12  ;;  %p2808_p4 = scmp.eq.s32.totalorder %s2492_s16, 0 }
   0xb   : > { %s2508_s21 = scalar_select %p25_p1, %s2426_s14, %s27_s19  }
   0xc   : > { %p2510_p5 = por %p35_p2, %p34_p0  ;;  %p2516_p6 = por %p2808_p4, %p40_p3 }
   0xd   : > { %p106_p7 = scmp.eq.s32.totalorder %s2492_s16, 1  ;;  %p112_p8 = scmp.eq.s32.totalorder %s1771_s17, 1 }
   0xe   : > { %s2812_s22 = scalar_select %p2510_p5, 1, 0 }
   0xf   : > { %s2813_s23 = scalar_select %p2516_p6, 1, 0 }
  0x10   : > { %p1772_p9 = scmp.ge.s32.totalorder %s2430_s15, 1  ;;  %p119_p10 = scmp.lt.s32.totalorder %s2430_s15, 3 }
  0x11   : > { %p2523_p11 = por %p106_p7, %p34_p0  ;;  %p2527_p12 = por %p112_p8, %p40_p3 }
  0x12   : > { %p2531_p13 = pnand %p1772_p9, %p119_p10  ;;  %s2432_s27 = smov [#allocation5]  }
  0x13   : > { %s2814_s24 = scalar_select %p2523_p11, 1, 0 }
  0x14   : > { %s2815_s25 = scalar_select %p2527_p12, 1, 0 }
  0x15   : > { %s2816_s26 = scalar_select %p2531_p13, 1, 0 }
  0x16   : > { %p2201_p1 = pneg %p2531_p13  ;;  %s131_s28 = sshll.u32 %s2432_s27, 4  ;;  %s132_s28 = int_to_ptr.vmem [resolvable:$true] %s131_s28 }
  0x17   : > { %s148_s30 = sand.u32 1, %s2426_s14   ;;  %s2302_s6 = scalar_lea.hbm %s2805_s1, 6144 }
  0x18   : > { %p2539_p2 = pnand %p2201_p1, %p2808_p4  ;;  %p2303_p7 = scmp.ne.s32.totalorder %s2805_s1, %s2302_s6 }
  0x19   : > { %p2309_p1 = scmp.lt.u32.totalorder %s2302_s6, %s2805_s1 }
  0x1a   : > { %p2304_p8 = pneg %p2539_p2 }
  0x1c   : > { %p2305_p9 = pnand %p2304_p8, %p2303_p7 }
  0x1e   : > { %p2306_p10 = pneg %p2305_p9 }
  0x20   : > { %p2311_p4 = pnand %p2309_p1, %p2306_p10 }
  0x22   : > { %2314 = shalt.err (!%p2311_p4)
}
  0x23   : > { %s2315_s11 = scalar_lea.vmem %s132_s28, 6144  ;;  %p2323_p11 = scmp.lt.s32.totalorder %s132_s28, %s132_s28 }
  0x24   : > { %p2316_p0 = scmp.ne.s32.totalorder %s132_s28, %s2315_s11  ;;  %p2324_p6 = scmp.lt.s32.totalorder %s2315_s11, %s2315_s11 }
  0x26   : > { %p2318_p3 = pnand %p2316_p0, %p2304_p8  ;;  %p2325_p13 = por %p2324_p6, %p2323_p11 }
  0x28   : > { %p2319_p12 = pneg %p2318_p3 }
  0x2a   : > { %p2326_p5 = pnand %p2325_p13, %p2319_p12 }
  0x2c   : > { %2329 = shalt.err (!%p2326_p5)
}
  0x2d   : > { %s2433_s17 = smov 128   ;;  %s2434_s19 = smov 8  }
  0x2e   : > { %2204 = dma.hbm_to_vmem [thread:$0]  (!%p2539_p2), %s2805_s1, 6144, %s132_s28, [#allocation6], %s2433_s17, %s2433_s17, %s2434_s19  }
  0x2f   : > { %p2818_p4 = scmp.ne.s32.totalorder %s2812_s22, 0  ;;  %p2819_p0 = scmp.lt.s32.totalorder %s2430_s15, 2 }
  0x30   : > { %s1775_s5 = sshll.u32 %s148_s30, 5  ;;  %s1776_s6 = sshll.u32 %s2430_s15, 7 }
  0x31   : > { %p2569_p3 = pnand %p2819_p0, %p2818_p4  ;;  %s2577_s29 = scalar_lea.hbm %s2804_s0, %s1776_s6 }
  0x32   : > { %s152_s28 = scalar_lea.vmem [#allocation2], %s1775_s5  ;;  %s2581_s9 = scalar_lea.sflag [#allocation3], %s148_s30 }
  0x33   : > { %s158_s22 = sshll.u32 %s152_s28, 4  ;;  %s2330_s10 = scalar_lea.hbm %s2577_s29, 512  ;;  %s2579_s22 = int_to_ptr.vmem [resolvable:$true] %s158_s22 }
  0x34   : > { %p2331_p5 = scmp.ne.s32.totalorder %s2577_s29, %s2330_s10  ;;  %p2332_p6 = pneg %p2569_p3 }
  0x35   : > { %s2335_s27 = scalar_lea.hbm %s2804_s0, 1024  ;;  %p2336_p13 = scmp.lt.u32.totalorder %s2577_s29, %s2804_s0 }
  0x36   : > { %p2333_p11 = pnand %p2332_p6, %p2331_p5  ;;  %p2337_p2 = scmp.lt.u32.totalorder %s2335_s27, %s2330_s10 }
  0x37   : > { %p2339_p8 = scmp.lt.u32.totalorder %s2330_s10, %s2577_s29 }
  0x38   : > { %p2334_p12 = pneg %p2333_p11  ;;  %p2338_p7 = por %p2337_p2, %p2336_p13 }
  0x3a   : > { %p2340_p9 = por %p2339_p8, %p2338_p7 }
  0x3c   : > { %p2341_p10 = pnand %p2340_p9, %p2334_p12 }
  0x3e   : > { %2344 = shalt.err (!%p2341_p10)
}
  0x3f   : > { %s2345_s30 = scalar_lea.vmem %s2579_s22, 512  ;;  %s2435_s5 = smov [#allocation2]  }
  0x40   : > { %p2346_p1 = scmp.ne.s32.totalorder %s2579_s22, %s2345_s30  ;;  %s2350_s8 = sshll.u32 %s2435_s5, 4  ;;  %s2351_s8 = int_to_ptr.vmem [resolvable:$false] %s2350_s8 }
  0x41   : > { %s2352_s28 = scalar_lea.vmem %s2351_s8, 1024  ;;  %p2353_p5 = scmp.lt.s32.totalorder %s2579_s22, %s2351_s8 }
  0x42   : > { %p2348_p4 = pnand %p2346_p1, %p2332_p6  ;;  %p2354_p11 = scmp.lt.s32.totalorder %s2352_s28, %s2345_s30 }
  0x44   : > { %p2349_p0 = pneg %p2348_p4  ;;  %p2355_p13 = por %p2354_p11, %p2353_p5 }
  0x46   : > { %p2356_p2 = pnand %p2355_p13, %p2349_p0 }
  0x48   : > { %2359 = shalt.err (!%p2356_p2)
}
  0x49   : > { %s2436_s10 = smov 256   ;;  %p2821_p6 = scmp.ne.s32.totalorder %s2816_s26, 0 }
  0x4a   : > { %2208 = dma.hbm_to_vmem [thread:$0]  (!%p2569_p3), %s2577_s29, 512, %s2579_s22, %s2581_s9, %s2436_s10, %s2433_s17, %s2434_s19  }
  0x4b   : > { %170 = sbr.rel (%p2821_p6) target bundleno = 2853 (0xb25), region = 32  ;;  %s2614_s11 = sand.u32 (!%p2821_p6), 1, %s2422_s13  }
  0x4c   : > { %s1778_s20 = sshll.u32 (!%p2821_p6), %s2614_s11, 5  ;;  %s173_s27 = scalar_lea.sflag (!%p2821_p6), [#allocation3], %s2614_s11 }
  0x4d   : > { %s176_s4 = scalar_lea.vmem (!%p2821_p6), [#allocation2], %s1778_s20  ;;  %p2822_p12 = scmp.ne.s32.totalorder (!%p2821_p6), %s2813_s23, 0 }
  0x52   : > { %2405 = dma.done.wait (%p2822_p12), %s173_s27, 512  }
  0x53   : > { %2407 = vsyncadd (%p2822_p12), %s173_s27, 4294966784  ;;  %p2823_p3 = scmp.eq.s32.totalorder %s2492_s16, 0 }
  0x55   : > { %2409 = dma.done.wait (%p2823_p3), [#allocation6], 6144   ;;  %p2824_p7 = pmov %p2823_p3 }
  0x56   : > { %v2437_v0 = vmov 0   ;;  %vm235_vm0 = vcmask 261120   ;;  %v203_v1 = vld [vmem:[%s176_s4] sm:$0xff]  ;;  %v204_v2 = vld [vmem:[%s176_s4 + $0x8] sm:$0xff]  ;;  %v205_v3 = vld [vmem:[%s176_s4 + $0x10] sm:$0xff]  ;;  %v2438_v16 = vmov 1  }
  0x57   : > { %2411 = vsyncadd (%p2824_p7), [#allocation6], 4294961152  ;;  %2266 = vset.pattern.permute.xlu0 %v2437_v0  ;;  %2267 = vset.pattern.permute.xlu1 %v2437_v0  ;;  %v2097_v4 = vpack.c.bf16 %v204_v2, %v203_v1  ;;  %v206_v5 = vld [vmem:[%s176_s4 + $0x18] sm:$0xff]  ;;  %v207_v6 = vld [vmem:[#allocation5] sm:$0xff]  ;;  %v2439_v39 = vmov 2   ;;  %v2440_v2 = vmov 3  }
  0x58   : > { %v2101_v7 = vpack.c.bf16 %v206_v5, %v205_v3  ;;  %1937 = vmatprep.mubr.msk.f32.mxu0 %vm235_vm0, %v207_v6  ;;  %v2632_v8 = vld [vmem:[%s2806_s2] sm:$0xff]  ;;  %v2638_v9 = vld [vmem:[%s2806_s2 + $0x10] sm:$0xff]  ;;  %v2644_v10 = vld [vmem:[%s2806_s2 + $0x8] sm:$0xff]  ;;  %s202_s7 = scalar_lea.vmem [#allocation7], %s1778_s20  ;;  %s1830_s5 = sshll.u32 %s2492_s16, 7 }
  0x59   : > { %2098 = vmatprep.subr.bf16.mxu0 %v2097_v4  ;;  %217 = vperm.xlu0 %2266, %v2632_v8   ;;  %v2649_v11 = vld [vmem:[%s2806_s2 + $0x18] sm:$0xff]  ;;  %v208_v12 = vld [vmem:[#allocation5 + $0x8] sm:$0xff]  ;;  %v209_v13 = vld [vmem:[#allocation5 + $0x10] sm:$0xff]  ;;  %s1688_s30 = sshll.u32 %s202_s7, 4  ;;  %s2760_s10 = scalar_lea.hbm %s2807_s3, %s1830_s5  ;;  %s2755_s30 = int_to_ptr.vmem [resolvable:$true] %s1688_s30 }
  0x5a   : > { %2100 = vmatpush3.bf16.msra.mxu0 %v2097_v4  ;;  %227 = vperm.xlu1 %2267, %v2638_v9   ;;  %v210_v14 = vld [vmem:[#allocation5 + $0x18] sm:$0xff]  ;;  %v338_v15 = vld [vmem:[#allocation5 + $0x20] sm:$0xff]  ;;  %v339_v35 = vld [vmem:[#allocation5 + $0x28] sm:$0xff]  ;;  %s1676_s16 = scalar_lea.sflag [#allocation4], %s2614_s11  ;;  %s2360_s20 = scalar_lea.vmem %s2755_s30, 512 }
  0x5b   : > { %2102 = vmatprep.subr.bf16.mxu0 %v2101_v7  ;;  %1951 = vmatprep.mubr.msk.f32.mxu1 %vm235_vm0, %v338_v15  ;;  %v340_v36 = vld [vmem:[#allocation5 + $0x30] sm:$0xff]  ;;  %v341_v37 = vld [vmem:[#allocation5 + $0x38] sm:$0xff]  ;;  %v464_v38 = vld [vmem:[#allocation5 + $0x40] sm:$0xff]  ;;  %p2361_p8 = scmp.ne.s32.totalorder %s2755_s30, %s2360_s20  ;;  %p2825_p9 = scmp.ne.s32.totalorder %s2814_s24, 0 }
  0x5c   : > { %v465_v62 = vld [vmem:[#allocation5 + $0x48] sm:$0xff]  ;;  %v466_v63 = vld [vmem:[#allocation5 + $0x50] sm:$0xff]  ;;  %v467_v0 = vld [vmem:[#allocation5 + $0x58] sm:$0xff]  ;;  %s2447_s27 = smov [#allocation7]  }
  0x5d   : > { %222 = vperm.xlu0 %2266, %v2644_v10   ;;  %v590_v1 = vld [vmem:[#allocation5 + $0x60] sm:$0xff]  ;;  %p2362_p10 = pnand %p2361_p8, %p2825_p9  ;;  %s2364_s4 = sshll.u32 %s2447_s27, 4  ;;  %s2365_s4 = int_to_ptr.vmem [resolvable:$false] %s2364_s4 }
  0x5e   : > { %2104 = vmatpush3.bf16.msra.mxu0 %v2101_v7  ;;  %232 = vperm.xlu1 %2267, %v2649_v11   ;;  %s2366_s23 = scalar_lea.vmem %s2365_s4, 1024  ;;  %p2367_p4 = scmp.lt.s32.totalorder %s2755_s30, %s2365_s4 }
  0x5f   : > { %p2363_p1 = pneg %p2362_p10  ;;  %p2368_p0 = scmp.lt.s32.totalorder %s2366_s23, %s2360_s20 }
  0x61   : > { %1938 = vmatmul.mubr.msk.f32.vlgmr.msra.gmra.mrb[0].mxu0 %vm235_vm0, %v208_v12  ;;  %2268 = vset.pattern.permute.xlu0 %v2438_v16  ;;  %p2369_p5 = por %p2368_p0, %p2367_p4 }
  0x62   : > { %1940 = vmatprep.mubr.msk.f32.mxu0 %vm235_vm0, %v209_v13  ;;  %2269 = vset.pattern.permute.xlu1 %v2438_v16 }
  0x63   : > { %347 = vperm.xlu1 %2269, %v2644_v10   ;;  %343 = vperm.xlu0 %2268, %v2632_v8   ;;  %p2370_p11 = pnand %p2369_p5, %p2363_p1 }
  0x65   : > { %1941 = vmatmul.mubr.msk.f32.gmra.mrb[2].mxu0 %vm235_vm0, %v210_v14 }
  0x66   : > { %1965 = vmatprep.mubr.msk.f32.mxu0 %vm235_vm0, %v464_v38 }
  0x67   : > { %351 = vperm.xlu1 %2269, %v2638_v9   ;;  %355 = vperm.xlu0 %2268, %v2649_v11  }
  0x6b   : > { %2270 = vset.pattern.permute.xlu1 %v2439_v39  ;;  %2271 = vset.pattern.permute.xlu0 %v2439_v39 }
  0x6c   : > { %469 = vperm.xlu1 %2270, %v2632_v8   ;;  %473 = vperm.xlu0 %2271, %v2644_v10  }
  0x70   : > { %477 = vperm.xlu1 %2270, %v2638_v9   ;;  %2272 = vset.pattern.permute.xlu0 %v2440_v2 }
  0x71   : > { %595 = vperm.xlu0 %2272, %v2632_v8  }
  0x74   : > { %481 = vperm.xlu1 %2270, %v2649_v11  }
  0x75   : > { %607 = vperm.xlu0 %2272, %v2649_v11  }
  0x78   : > { %2273 = vset.pattern.permute.xlu1 %v2440_v2 }
  0x79   : > { %599 = vperm.xlu1 %2273, %v2644_v10  }
  0x7d   : > { %603 = vperm.xlu1 %2273, %v2638_v9  }
  0xd8   : > { %v218_v17 = vpop.permute.xlu0 %217 }
  0xd9   : > { %v228_v18 = vpop.permute.xlu1 %227 }
  0xdc   : > { %v223_v19 = vpop.permute.xlu0 %222 }
  0xdd   : > { %v233_v25 = vpop.permute.xlu1 %232 }
  0xe2   : > { %v344_v40 = vpop.permute.xlu0 %343  ;;  %v348_v41 = vpop.permute.xlu1 %347 }
  0xe6   : > { %v356_v47 = vpop.permute.xlu0 %355  ;;  %v352_v51 = vpop.permute.xlu1 %351 }
  0xeb   : > { %v470_v3 = vpop.permute.xlu1 %469  ;;  %v474_v5 = vpop.permute.xlu0 %473 }
  0xef   : > { %v478_v4 = vpop.permute.xlu1 %477 }
  0xf3   : > { %v482_v15 = vpop.permute.xlu1 %481 }
 0x134   : > { %v1939_v20 = vpop.f32.mrb[0].mxu0 }
 0x135   : > { %v320_v21 = vadd.f32 %v1939_v20, %v223_v19  ;;  %v314_v22 = vpop.f32.mrb[1].mxu0 }
 0x136   : > { %v315_v23 = vadd.f32 %v314_v22, %v218_v17 }
 0x137   : > { %v334_v24 = vmax.f32 %v320_v21, 0.0 }
 0x138   : > { %v333_v26 = vmax.f32 %v315_v23, 0.0  ;;  %v1942_v27 = vpop.f32.mrb[2].mxu0 }
 0x139   : > { %v330_v28 = vadd.f32 %v1942_v27, %v233_v25  ;;  %v324_v29 = vpop.f32.mrb[3].mxu0 }
 0x13a   : > { %v325_v30 = vadd.f32 %v324_v29, %v228_v18  ;;  %v2105_v31 = vpack.c.bf16 %v334_v24, %v333_v26  ;;  %v591_v29 = vld [vmem:[#allocation5 + $0x68] sm:$0xff] }
 0x13b   : > { %v336_v32 = vmax.f32 %v330_v28, 0.0 }
 0x13c   : > { %v335_v33 = vmax.f32 %v325_v30, 0.0  ;;  %2106 = vmatprep.subr.bf16.mxu1 %v2105_v31  ;;  %v592_v30 = vld [vmem:[#allocation5 + $0x70] sm:$0xff] }
 0x13d   : > { %2108 = vmatpush3.bf16.msra.mxu1 %v2105_v31  ;;  %v593_v31 = vld [vmem:[#allocation5 + $0x78] sm:$0xff] }
 0x13e   : > { %v2109_v34 = vpack.c.bf16 %v336_v32, %v335_v33 }
 0x140   : > { %2110 = vmatprep.subr.bf16.mxu1 %v2109_v34 }
 0x141   : > { %2112 = vmatpush3.bf16.msra.mxu1 %v2109_v34  ;;  %v596_v34 = vpop.permute.xlu0 %595 }
 0x144   : > { %1952 = vmatmul.mubr.msk.f32.vlgmr.msra.gmra.mrb[0].mxu1 %vm235_vm0, %v339_v35  ;;  %v600_v35 = vpop.permute.xlu1 %599 }
 0x145   : > { %1954 = vmatprep.mubr.msk.f32.mxu1 %vm235_vm0, %v340_v36 }
 0x148   : > { %1955 = vmatmul.mubr.msk.f32.gmra.mrb[2].mxu1 %vm235_vm0, %v341_v37 }
 0x149   : > { %1979 = vmatprep.mubr.msk.f32.mxu1 %vm235_vm0, %v590_v1 }
 0x217   : > { %v1953_v42 = vpop.f32.mrb[0].mxu1 }
 0x218   : > { %v442_v43 = vadd.f32 %v1953_v42, %v348_v41  ;;  %v436_v44 = vpop.f32.mrb[1].mxu1 }
 0x219   : > { %v437_v45 = vadd.f32 %v436_v44, %v344_v40  ;;  %v608_v40 = vpop.permute.xlu0 %607 }
 0x21a   : > { %v456_v46 = vmax.f32 %v442_v43, 0.0  ;;  %v604_v43 = vpop.permute.xlu1 %603 }
 0x21b   : > { %v455_v48 = vmax.f32 %v437_v45, 0.0  ;;  %v1956_v49 = vpop.f32.mrb[2].mxu1 }
 0x21c   : > { %v460_v50 = vadd.f32 %v456_v46, %v334_v24  ;;  %v452_v52 = vadd.f32 %v1956_v49, %v356_v47  ;;  %v446_v53 = vpop.f32.mrb[3].mxu1  ;;  %v710_v49 = vld [vmem:[#allocation5 + $0x90] sm:$0xff] }
 0x21d   : > { %v459_v54 = vadd.f32 %v455_v48, %v333_v26  ;;  %v447_v55 = vadd.f32 %v446_v53, %v352_v51  ;;  %v709_v48 = vld [vmem:[#allocation5 + $0x88] sm:$0xff]  ;;  %v830_v51 = vld [vmem:[#allocation5 + $0xa0] sm:$0xff] }
 0x21e   : > { %v458_v56 = vmax.f32 %v452_v52, 0.0  ;;  %v2442_v52 = vmov 5  }
 0x21f   : > { %v457_v57 = vmax.f32 %v447_v55, 0.0  ;;  %v2113_v58 = vpack.c.bf16 %v460_v50, %v459_v54 }
 0x220   : > { %v462_v59 = vadd.f32 %v458_v56, %v336_v32  ;;  %v708_v32 = vld [vmem:[#allocation5 + $0x80] sm:$0xff] }
 0x221   : > { %v461_v60 = vadd.f32 %v457_v57, %v335_v33  ;;  %2114 = vmatprep.subr.bf16.mxu0 %v2113_v58  ;;  %v2441_v33 = vmov 4  }
 0x222   : > { %2116 = vmatpush3.bf16.msra.mxu0 %v2113_v58  ;;  %2274 = vset.pattern.permute.xlu1 %v2441_v33 }
 0x223   : > { %v2117_v61 = vpack.c.bf16 %v462_v59, %v461_v60  ;;  %2275 = vset.pattern.permute.xlu0 %v2441_v33  ;;  %713 = vperm.xlu1 %2274, %v2632_v8  }
 0x224   : > { %717 = vperm.xlu0 %2275, %v2644_v10  }
 0x225   : > { %2118 = vmatprep.subr.bf16.mxu0 %v2117_v61 }
 0x226   : > { %2120 = vmatpush3.bf16.msra.mxu0 %v2117_v61 }
 0x227   : > { %721 = vperm.xlu1 %2274, %v2638_v9  }
 0x228   : > { %2276 = vset.pattern.permute.xlu0 %v2442_v52 }
 0x229   : > { %1966 = vmatmul.mubr.msk.f32.vlgmr.msra.gmra.mrb[4].mxu0 %vm235_vm0, %v465_v62  ;;  %835 = vperm.xlu0 %2276, %v2632_v8  }
 0x22a   : > { %1968 = vmatprep.mubr.msk.f32.mxu0 %vm235_vm0, %v466_v63 }
 0x22b   : > { %725 = vperm.xlu1 %2274, %v2649_v11  }
 0x22d   : > { %1969 = vmatmul.mubr.msk.f32.gmra.mrb[6].mxu0 %vm235_vm0, %v467_v0  ;;  %847 = vperm.xlu0 %2276, %v2649_v11  }
 0x22e   : > { %1993 = vmatprep.mubr.msk.f32.mxu0 %vm235_vm0, %v708_v32 }
 0x22f   : > { %2277 = vset.pattern.permute.xlu1 %v2442_v52 }
 0x230   : > { %839 = vperm.xlu1 %2277, %v2644_v10  }
 0x234   : > { %843 = vperm.xlu1 %2277, %v2638_v9  }
 0x2a2   : > { %v714_v53 = vpop.permute.xlu1 %713 }
 0x2a3   : > { %v718_v55 = vpop.permute.xlu0 %717 }
 0x2fc   : > { %v1967_v6 = vpop.f32.mrb[4].mxu0 }
 0x2fd   : > { %v568_v7 = vadd.f32 %v1967_v6, %v474_v5  ;;  %v562_v12 = vpop.f32.mrb[5].mxu0 }
 0x2fe   : > { %v563_v13 = vadd.f32 %v562_v12, %v470_v3  ;;  %v832_v12 = vld [vmem:[#allocation5 + $0xb0] sm:$0xff] }
 0x2ff   : > { %v582_v14 = vmax.f32 %v568_v7, 0.0  ;;  %v831_v7 = vld [vmem:[#allocation5 + $0xa8] sm:$0xff] }
 0x300   : > { %v581_v16 = vmax.f32 %v563_v13, 0.0  ;;  %v1970_v17 = vpop.f32.mrb[6].mxu0  ;;  %v833_v13 = vld [vmem:[#allocation5 + $0xb8] sm:$0xff] }
 0x301   : > { %v586_v18 = vadd.f32 %v582_v14, %v460_v50  ;;  %v578_v19 = vadd.f32 %v1970_v17, %v482_v15  ;;  %v572_v20 = vpop.f32.mrb[7].mxu0  ;;  %v711_v50 = vld [vmem:[#allocation5 + $0x98] sm:$0xff]  ;;  %v952_v14 = vld [vmem:[#allocation5 + $0xc0] sm:$0xff]  ;;  %v836_v15 = vpop.permute.xlu0 %835 }
 0x302   : > { %v585_v21 = vadd.f32 %v581_v16, %v459_v54  ;;  %v573_v22 = vadd.f32 %v572_v20, %v478_v4  ;;  %v722_v54 = vpop.permute.xlu1 %721 }
 0x303   : > { %v584_v23 = vmax.f32 %v578_v19, 0.0 }
 0x304   : > { %v583_v24 = vmax.f32 %v573_v22, 0.0  ;;  %v2121_v25 = vpack.c.bf16 %v586_v18, %v585_v21 }
 0x305   : > { %v588_v26 = vadd.f32 %v584_v23, %v462_v59  ;;  %v848_v21 = vpop.permute.xlu0 %847 }
 0x306   : > { %v587_v27 = vadd.f32 %v583_v24, %v461_v60  ;;  %2122 = vmatprep.subr.bf16.mxu1 %v2121_v25  ;;  %v726_v60 = vpop.permute.xlu1 %725 }
 0x307   : > { %2124 = vmatpush3.bf16.msra.mxu1 %v2121_v25 }
 0x308   : > { %v2125_v28 = vpack.c.bf16 %v588_v26, %v587_v27 }
 0x30a   : > { %2126 = vmatprep.subr.bf16.mxu1 %v2125_v28  ;;  %v840_v16 = vpop.permute.xlu1 %839 }
 0x30b   : > { %2128 = vmatpush3.bf16.msra.mxu1 %v2125_v28 }
 0x30e   : > { %1980 = vmatmul.mubr.msk.f32.vlgmr.msra.gmra.mrb[4].mxu1 %vm235_vm0, %v591_v29  ;;  %v844_v23 = vpop.permute.xlu1 %843 }
 0x30f   : > { %1982 = vmatprep.mubr.msk.f32.mxu1 %vm235_vm0, %v592_v30 }
 0x312   : > { %1983 = vmatmul.mubr.msk.f32.gmra.mrb[6].mxu1 %vm235_vm0, %v593_v31 }
 0x313   : > { %2007 = vmatprep.mubr.msk.f32.mxu1 %vm235_vm0, %v830_v51 }
 0x3e1   : > { %v1981_v36 = vpop.f32.mrb[4].mxu1 }
 0x3e2   : > { %v2685_v37 = vadd.f32 %v1981_v36, %v600_v35  ;;  %v688_v38 = vpop.f32.mrb[5].mxu1 }
 0x3e3   : > { %v2687_v39 = vadd.f32 %v688_v38, %v596_v34 }
 0x3e5   : > { %v2129_v41 = vpack.c.bf16 %v2685_v37, %v2687_v39  ;;  %v1984_v42 = vpop.f32.mrb[6].mxu1 }
 0x3e6   : > { %v2691_v44 = vadd.f32 %v1984_v42, %v608_v40  ;;  %v698_v45 = vpop.f32.mrb[7].mxu1 }
 0x3e7   : > { %v2693_v46 = vadd.f32 %v698_v45, %v604_v43  ;;  %2130 = vmatprep.subr.bf16.mxu0 %v2129_v41  ;;  %v953_v43 = vld [vmem:[#allocation5 + $0xc8] sm:$0xff]  ;;  %v954_v45 = vld [vmem:[#allocation5 + $0xd0] sm:$0xff] }
 0x3e8   : > { %2132 = vmatpush3.bf16.msra.mxu0 %v2129_v41 }
 0x3e9   : > { %v2133_v47 = vpack.c.bf16 %v2691_v44, %v2693_v46 }
 0x3eb   : > { %2134 = vmatprep.subr.bf16.mxu0 %v2133_v47 }
 0x3ec   : > { %2136 = vmatpush3.bf16.msra.mxu0 %v2133_v47  ;;  %v955_v47 = vld [vmem:[#allocation5 + $0xd8] sm:$0xff] }
 0x3ef   : > { %1994 = vmatmul.mubr.msk.f32.vlgmr.msra.gmra.mrb[8].mxu0 %vm235_vm0, %v709_v48  ;;  %v1074_v48 = vld [vmem:[#allocation5 + $0xe0] sm:$0xff] }
 0x3f0   : > { %1996 = vmatprep.mubr.msk.f32.mxu0 %vm235_vm0, %v710_v49 }
 0x3f3   : > { %1997 = vmatmul.mubr.msk.f32.gmra.mrb[10].mxu0 %vm235_vm0, %v711_v50 }
 0x3f4   : > { %2021 = vmatprep.mubr.msk.f32.mxu0 %vm235_vm0, %v952_v14 }
 0x4c2   : > { %v1995_v56 = vpop.f32.mrb[8].mxu0 }
 0x4c3   : > { %v812_v57 = vadd.f32 %v1995_v56, %v718_v55  ;;  %v806_v58 = vpop.f32.mrb[9].mxu0 }
 0x4c4   : > { %v807_v59 = vadd.f32 %v806_v58, %v714_v53 }
 0x4c5   : > { %2286 = vtanh.f32 %v812_v57 }
 0x4c6   : > { %2288 = vtanh.f32 %v807_v59  ;;  %v1998_v61 = vpop.f32.mrb[10].mxu0 }
 0x4c7   : > { %v822_v62 = vadd.f32 %v1998_v61, %v726_v60  ;;  %v816_v63 = vpop.f32.mrb[11].mxu0 }
 0x4c8   : > { %v817_v0 = vadd.f32 %v816_v63, %v722_v54 }
 0x4c9   : > { %2290 = vtanh.f32 %v822_v62 }
 0x4ca   : > { %2292 = vtanh.f32 %v817_v0 }
 0x4cf   : > { %v2287_v1 = vpop.eup %2286 }
 0x4d0   : > { %v2289_v2 = vpop.eup %2288  ;;  %v965_v49 = vmul.f32 %v2287_v1, %v2287_v1 }
 0x4d1   : > { %v2137_v3 = vpack.c.bf16 %v2287_v1, %v2289_v2  ;;  %v964_v50 = vmul.f32 %v2289_v2, %v2289_v2  ;;  %v1075_v1 = vld [vmem:[#allocation5 + $0xe8] sm:$0xff]  ;;  %v1076_v2 = vld [vmem:[#allocation5 + $0xf0] sm:$0xff] }
 0x4d2   : > { %v969_v51 = vsub.f32 1.0, %v965_v49  ;;  %v2445_v49 = vmov 8  }
 0x4d3   : > { %v2291_v4 = vpop.eup %2290  ;;  %2138 = vmatprep.subr.bf16.mxu1 %v2137_v3  ;;  %v968_v54 = vsub.f32 1.0, %v964_v50 }
 0x4d4   : > { %v2293_v5 = vpop.eup %2292  ;;  %2140 = vmatpush3.bf16.msra.mxu1 %v2137_v3  ;;  %v967_v52 = vmul.f32 %v2291_v4, %v2291_v4 }
 0x4d5   : > { %v2141_v6 = vpack.c.bf16 %v2291_v4, %v2293_v5  ;;  %v966_v55 = vmul.f32 %v2293_v5, %v2293_v5  ;;  %v1077_v4 = vld [vmem:[#allocation5 + $0xf8] sm:$0xff]  ;;  %v1180_v5 = vld [vmem:[#allocation5 + $0x100] sm:$0xff] }
 0x4d6   : > { %v971_v59 = vsub.f32 1.0, %v967_v52 }
 0x4d7   : > { %2142 = vmatprep.subr.bf16.mxu1 %v2141_v6  ;;  %v970_v62 = vsub.f32 1.0, %v966_v55 }
 0x4d8   : > { %2144 = vmatpush3.bf16.msra.mxu1 %v2141_v6 }
 0x4db   : > { %2008 = vmatmul.mubr.msk.f32.vlgmr.msra.gmra.mrb[8].mxu1 %vm235_vm0, %v831_v7  ;;  %v2443_v7 = vmov 6  }
 0x4dc   : > { %2010 = vmatprep.mubr.msk.f32.mxu1 %vm235_vm0, %v832_v12  ;;  %2278 = vset.pattern.permute.xlu1 %v2443_v7 }
 0x4dd   : > { %2279 = vset.pattern.permute.xlu0 %v2443_v7  ;;  %1185 = vperm.xlu1 %2278, %v2632_v8  }
 0x4de   : > { %1189 = vperm.xlu0 %2279, %v2644_v10  }
 0x4df   : > { %2011 = vmatmul.mubr.msk.f32.gmra.mrb[10].mxu1 %vm235_vm0, %v833_v13 }
 0x4e0   : > { %2035 = vmatprep.mubr.msk.f32.mxu1 %vm235_vm0, %v1074_v48  ;;  %v1428_v48 = vld [vmem:[#allocation5 + $0x140] sm:$0xff] }
 0x4e1   : > { %1193 = vperm.xlu1 %2278, %v2638_v9  }
 0x4e5   : > { %1197 = vperm.xlu1 %2278, %v2649_v11  }
 0x5ae   : > { %v2009_v17 = vpop.f32.mrb[8].mxu1 }
 0x5af   : > { %v934_v18 = vadd.f32 %v2009_v17, %v840_v16  ;;  %v928_v19 = vpop.f32.mrb[9].mxu1 }
 0x5b0   : > { %v929_v20 = vadd.f32 %v928_v19, %v836_v15 }
 0x5b1   : > { %2294 = vtanh.f32 %v934_v18 }
 0x5b2   : > { %2296 = vtanh.f32 %v929_v20  ;;  %v2012_v22 = vpop.f32.mrb[10].mxu1 }
 0x5b3   : > { %v944_v24 = vadd.f32 %v2012_v22, %v848_v21  ;;  %v938_v25 = vpop.f32.mrb[11].mxu1  ;;  %v1181_v22 = vld [vmem:[#allocation5 + $0x108] sm:$0xff] }
 0x5b4   : > { %v939_v26 = vadd.f32 %v938_v25, %v844_v23  ;;  %v1182_v23 = vld [vmem:[#allocation5 + $0x110] sm:$0xff]  ;;  %v1190_v25 = vpop.permute.xlu0 %1189 }
 0x5b5   : > { %2298 = vtanh.f32 %v944_v24 }
 0x5b6   : > { %2300 = vtanh.f32 %v939_v26 }
 0x5bb   : > { %v2295_v27 = vpop.eup %2294 }
 0x5bc   : > { %v2297_v28 = vpop.eup %2296  ;;  %v957_v29 = vmul.f32 %v2295_v27, %v2295_v27 }
 0x5bd   : > { %v956_v30 = vmul.f32 %v2297_v28, %v2297_v28 }
 0x5be   : > { %v961_v31 = vsub.f32 1.0, %v957_v29 }
 0x5bf   : > { %v2299_v32 = vpop.eup %2298  ;;  %v960_v33 = vsub.f32 1.0, %v956_v30 }
 0x5c0   : > { %v2301_v34 = vpop.eup %2300  ;;  %v959_v35 = vmul.f32 %v2299_v32, %v2299_v32 }
 0x5c1   : > { %v958_v36 = vmul.f32 %v2301_v34, %v2301_v34  ;;  %v2145_v38 = vpack.c.bf16 %v961_v31, %v960_v33 }
 0x5c2   : > { %v963_v40 = vsub.f32 1.0, %v959_v35 }
 0x5c3   : > { %v962_v41 = vsub.f32 1.0, %v958_v36  ;;  %2146 = vmatprep.subr.bf16.mxu0 %v2145_v38 }
 0x5c4   : > { %2148 = vmatpush3.bf16.msra.mxu0 %v2145_v38 }
 0x5c5   : > { %v2149_v42 = vpack.c.bf16 %v963_v40, %v962_v41 }
 0x5c7   : > { %2150 = vmatprep.subr.bf16.mxu0 %v2149_v42 }
 0x5c8   : > { %2152 = vmatpush3.bf16.msra.mxu0 %v2149_v42 }
 0x5cb   : > { %2022 = vmatmul.mubr.msk.f32.vlgmr.msra.gmra.mrb[12].mxu0 %vm235_vm0, %v953_v43  ;;  %v1303_v43 = vld [vmem:[#allocation5 + $0x128] sm:$0xff] }
 0x5cc   : > { %2024 = vmatprep.mubr.msk.f32.mxu0 %vm235_vm0, %v954_v45  ;;  %v1304_v45 = vld [vmem:[#allocation5 + $0x130] sm:$0xff] }
 0x5cf   : > { %2025 = vmatmul.mubr.msk.f32.gmra.mrb[14].mxu0 %vm235_vm0, %v955_v47  ;;  %v1305_v47 = vld [vmem:[#allocation5 + $0x138] sm:$0xff] }
 0x5d0   : > { %2049 = vmatprep.mubr.msk.f32.mxu0 %vm235_vm0, %v1180_v5 }
 0x69e   : > { %v2023_v53 = vpop.f32.mrb[12].mxu0 }
 0x69f   : > { %v1070_v56 = vmul.f32 %v2023_v53, %v969_v51  ;;  %v1050_v57 = vpop.f32.mrb[13].mxu0 }
 0x6a0   : > { %v1069_v58 = vmul.f32 %v1050_v57, %v968_v54 }
 0x6a2   : > { %v2153_v60 = vpack.c.bf16 %v1070_v56, %v1069_v58  ;;  %v2026_v61 = vpop.f32.mrb[14].mxu0 }
 0x6a3   : > { %v1072_v63 = vmul.f32 %v2026_v61, %v971_v59  ;;  %v1060_v0 = vpop.f32.mrb[15].mxu0 }
 0x6a4   : > { %v1071_v3 = vmul.f32 %v1060_v0, %v970_v62  ;;  %2154 = vmatprep.subr.bf16.mxu1 %v2153_v60 }
 0x6a5   : > { %2156 = vmatpush3.bf16.msra.mxu1 %v2153_v60 }
 0x6a6   : > { %v2157_v6 = vpack.c.bf16 %v1072_v63, %v1071_v3 }
 0x6a8   : > { %2158 = vmatprep.subr.bf16.mxu1 %v2157_v6 }
 0x6a9   : > { %2160 = vmatpush3.bf16.msra.mxu1 %v2157_v6 }
 0x6ac   : > { %2036 = vmatmul.mubr.msk.f32.vlgmr.msra.gmra.mrb[12].mxu1 %vm235_vm0, %v1075_v1 }
 0x6ad   : > { %2038 = vmatprep.mubr.msk.f32.mxu1 %vm235_vm0, %v1076_v2 }
 0x6b0   : > { %2039 = vmatmul.mubr.msk.f32.gmra.mrb[14].mxu1 %vm235_vm0, %v1077_v4 }
 0x77f   : > { %v2037_v12 = vpop.f32.mrb[12].mxu1 }
 0x780   : > { %v1176_v13 = vadd.f32 %v2037_v12, %v2685_v37  ;;  %v1156_v14 = vpop.f32.mrb[13].mxu1  ;;  %v1183_v37 = vld [vmem:[#allocation5 + $0x118] sm:$0xff]  ;;  %v1429_v12 = vld [vmem:[#allocation5 + $0x148] sm:$0xff] }
 0x781   : > { %v1175_v15 = vadd.f32 %v1156_v14, %v2687_v39  ;;  %v1302_v39 = vld [vmem:[#allocation5 + $0x120] sm:$0xff]  ;;  %v1431_v14 = vld [vmem:[#allocation5 + $0x158] sm:$0xff] }
 0x782   : > { %2063 = vmatprep.mubr.msk.f32.mxu1 %vm235_vm0, %v1302_v39 }
 0x783   : > { %v2161_v16 = vpack.c.bf16 %v1176_v13, %v1175_v15  ;;  %v2040_v17 = vpop.f32.mrb[14].mxu1  ;;  %v1430_v13 = vld [vmem:[#allocation5 + $0x150] sm:$0xff]  ;;  %v1554_v15 = vld [vmem:[#allocation5 + $0x160] sm:$0xff] }
 0x784   : > { %v1178_v18 = vadd.f32 %v2040_v17, %v2691_v44  ;;  %v1166_v19 = vpop.f32.mrb[15].mxu1  ;;  %v2444_v44 = vmov 7  }
 0x785   : > { %v1177_v20 = vadd.f32 %v1166_v19, %v2693_v46  ;;  %2162 = vmatprep.subr.bf16.mxu0 %v2161_v16  ;;  %2281 = vset.pattern.permute.xlu1 %v2444_v44  ;;  %v1186_v46 = vpop.permute.xlu1 %1185 }
 0x786   : > { %2164 = vmatpush3.bf16.msra.mxu0 %v2161_v16  ;;  %2280 = vset.pattern.permute.xlu0 %v2444_v44  ;;  %v2446_v16 = vmov 9  }
 0x787   : > { %v2165_v21 = vpack.c.bf16 %v1178_v18, %v1177_v20  ;;  %1311 = vperm.xlu1 %2281, %v2644_v10   ;;  %1307 = vperm.xlu0 %2280, %v2632_v8  }
 0x789   : > { %2166 = vmatprep.subr.bf16.mxu0 %v2165_v21  ;;  %v1194_v24 = vpop.permute.xlu1 %1193 }
 0x78a   : > { %2168 = vmatpush3.bf16.msra.mxu0 %v2165_v21 }
 0x78b   : > { %1315 = vperm.xlu1 %2281, %v2638_v9   ;;  %1319 = vperm.xlu0 %2280, %v2649_v11  }
 0x78d   : > { %2050 = vmatmul.mubr.msk.f32.vlgmr.msra.gmra.mrb[16].mxu0 %vm235_vm0, %v1181_v22  ;;  %v1198_v31 = vpop.permute.xlu1 %1197 }
 0x78e   : > { %2052 = vmatprep.mubr.msk.f32.mxu0 %vm235_vm0, %v1182_v23 }
 0x78f   : > { %2282 = vset.pattern.permute.xlu1 %v2445_v49  ;;  %2283 = vset.pattern.permute.xlu0 %v2445_v49 }
 0x790   : > { %1433 = vperm.xlu1 %2282, %v2632_v8   ;;  %1437 = vperm.xlu0 %2283, %v2644_v10  }
 0x791   : > { %2053 = vmatmul.mubr.msk.f32.gmra.mrb[18].mxu0 %vm235_vm0, %v1183_v37 }
 0x792   : > { %2077 = vmatprep.mubr.msk.f32.mxu0 %vm235_vm0, %v1428_v48 }
 0x794   : > { %1441 = vperm.xlu1 %2282, %v2638_v9   ;;  %2284 = vset.pattern.permute.xlu0 %v2446_v16 }
 0x795   : > { %1559 = vperm.xlu0 %2284, %v2632_v8  }
 0x798   : > { %1445 = vperm.xlu1 %2282, %v2649_v11  }
 0x799   : > { %1571 = vperm.xlu0 %2284, %v2649_v11  }
 0x79c   : > { %2285 = vset.pattern.permute.xlu1 %v2446_v16 }
 0x79d   : > { %1563 = vperm.xlu1 %2285, %v2644_v10  }
 0x7a1   : > { %1567 = vperm.xlu1 %2285, %v2638_v9  }
 0x806   : > { %v1308_v50 = vpop.permute.xlu0 %1307  ;;  %v1312_v51 = vpop.permute.xlu1 %1311 }
 0x80a   : > { %v1320_v57 = vpop.permute.xlu0 %1319  ;;  %v1316_v61 = vpop.permute.xlu1 %1315 }
 0x80f   : > { %v1434_v17 = vpop.permute.xlu1 %1433  ;;  %v1438_v19 = vpop.permute.xlu0 %1437 }
 0x813   : > { %v1442_v18 = vpop.permute.xlu1 %1441 }
 0x817   : > { %v1446_v39 = vpop.permute.xlu1 %1445 }
 0x860   : > { %v2051_v26 = vpop.f32.mrb[16].mxu0 }
 0x861   : > { %v1284_v27 = vadd.f32 %v2051_v26, %v1190_v25  ;;  %v1278_v28 = vpop.f32.mrb[17].mxu0 }
 0x862   : > { %v1279_v29 = vadd.f32 %v1278_v28, %v1186_v46 }
 0x863   : > { %v1298_v30 = vmax.f32 %v1284_v27, 0.0 }
 0x864   : > { %v1297_v32 = vmax.f32 %v1279_v29, 0.0  ;;  %v2054_v33 = vpop.f32.mrb[18].mxu0 }
 0x865   : > { %v1294_v34 = vadd.f32 %v2054_v33, %v1198_v31  ;;  %v1288_v35 = vpop.f32.mrb[19].mxu0  ;;  %v1555_v31 = vld [vmem:[#allocation5 + $0x168] sm:$0xff]  ;;  %v1557_v33 = vld [vmem:[#allocation5 + $0x178] sm:$0xff] }
 0x866   : > { %v2169_v36 = vpack.c.bf16 %v1298_v30, %v1297_v32  ;;  %v1289_v38 = vadd.f32 %v1288_v35, %v1194_v24  ;;  %v1564_v35 = vpop.permute.xlu1 %1563 }
 0x867   : > { %v1300_v40 = vmax.f32 %v1294_v34, 0.0  ;;  %v1560_v34 = vpop.permute.xlu0 %1559 }
 0x868   : > { %v1299_v41 = vmax.f32 %v1289_v38, 0.0  ;;  %2170 = vmatprep.subr.bf16.mxu1 %v2169_v36 }
 0x869   : > { %2172 = vmatpush3.bf16.msra.mxu1 %v2169_v36 }
 0x86a   : > { %v2173_v42 = vpack.c.bf16 %v1300_v40, %v1299_v41 }
 0x86c   : > { %2174 = vmatprep.subr.bf16.mxu1 %v2173_v42 }
 0x86d   : > { %2176 = vmatpush3.bf16.msra.mxu1 %v2173_v42  ;;  %v1572_v42 = vpop.permute.xlu0 %1571 }
 0x870   : > { %2064 = vmatmul.mubr.msk.f32.vlgmr.msra.gmra.mrb[16].mxu1 %vm235_vm0, %v1303_v43 }
 0x871   : > { %2066 = vmatprep.mubr.msk.f32.mxu1 %vm235_vm0, %v1304_v45  ;;  %v1568_v45 = vpop.permute.xlu1 %1567 }
 0x874   : > { %2067 = vmatmul.mubr.msk.f32.gmra.mrb[18].mxu1 %vm235_vm0, %v1305_v47 }
 0x875   : > { %2091 = vmatprep.mubr.msk.f32.mxu1 %vm235_vm0, %v1554_v15 }
 0x943   : > { %v2065_v52 = vpop.f32.mrb[16].mxu1 }
 0x944   : > { %v1406_v53 = vadd.f32 %v2065_v52, %v1312_v51  ;;  %v1400_v54 = vpop.f32.mrb[17].mxu1 }
 0x945   : > { %v1401_v55 = vadd.f32 %v1400_v54, %v1308_v50 }
 0x946   : > { %v1420_v56 = vmax.f32 %v1406_v53, 0.0 }
 0x947   : > { %v1419_v58 = vmax.f32 %v1401_v55, 0.0  ;;  %v2068_v59 = vpop.f32.mrb[18].mxu1 }
 0x948   : > { %v1424_v60 = vadd.f32 %v1420_v56, %v1298_v30  ;;  %v1416_v62 = vadd.f32 %v2068_v59, %v1320_v57  ;;  %v1410_v63 = vpop.f32.mrb[19].mxu1 }
 0x949   : > { %v1423_v0 = vadd.f32 %v1419_v58, %v1297_v32  ;;  %v1411_v3 = vadd.f32 %v1410_v63, %v1316_v61  ;;  %v1556_v32 = vld [vmem:[#allocation5 + $0x170] sm:$0xff] }
 0x94a   : > { %v1422_v6 = vmax.f32 %v1416_v62, 0.0 }
 0x94b   : > { %v1421_v1 = vmax.f32 %v1411_v3, 0.0  ;;  %v2177_v2 = vpack.c.bf16 %v1424_v60, %v1423_v0 }
 0x94c   : > { %v1426_v4 = vadd.f32 %v1422_v6, %v1300_v40 }
 0x94d   : > { %v1425_v5 = vadd.f32 %v1421_v1, %v1299_v41  ;;  %2178 = vmatprep.subr.bf16.mxu0 %v2177_v2 }
 0x94e   : > { %2180 = vmatpush3.bf16.msra.mxu0 %v2177_v2 }
 0x94f   : > { %v2181_v7 = vpack.c.bf16 %v1426_v4, %v1425_v5 }
 0x951   : > { %2182 = vmatprep.subr.bf16.mxu0 %v2181_v7 }
 0x952   : > { %2184 = vmatpush3.bf16.msra.mxu0 %v2181_v7 }
 0x955   : > { %2078 = vmatmul.mubr.msk.f32.vlgmr.msra.gmra.mrb[20].mxu0 %vm235_vm0, %v1429_v12 }
 0x956   : > { %2080 = vmatprep.mubr.msk.f32.mxu0 %vm235_vm0, %v1430_v13 }
 0x959   : > { %2081 = vmatmul.mubr.msk.f32.gmra.mrb[22].mxu0 %vm235_vm0, %v1431_v14 }
 0xa28   : > { %v2079_v20 = vpop.f32.mrb[20].mxu0 }
 0xa29   : > { %v1532_v21 = vadd.f32 %v2079_v20, %v1438_v19  ;;  %v1526_v22 = vpop.f32.mrb[21].mxu0 }
 0xa2a   : > { %v1527_v23 = vadd.f32 %v1526_v22, %v1434_v17 }
 0xa2b   : > { %v1546_v37 = vmax.f32 %v1532_v21, 0.0 }
 0xa2c   : > { %v1545_v44 = vmax.f32 %v1527_v23, 0.0  ;;  %v2082_v46 = vpop.f32.mrb[22].mxu0 }
 0xa2d   : > { %v1550_v24 = vadd.f32 %v1546_v37, %v1424_v60  ;;  %v1542_v25 = vadd.f32 %v2082_v46, %v1446_v39  ;;  %v1536_v10 = vpop.f32.mrb[23].mxu0 }
 0xa2e   : > { %v1549_v26 = vadd.f32 %v1545_v44, %v1423_v0  ;;  %v1537_v8 = vadd.f32 %v1536_v10, %v1442_v18 }
 0xa2f   : > { %v1548_v27 = vmax.f32 %v1542_v25, 0.0 }
 0xa30   : > { %v1547_v9 = vmax.f32 %v1537_v8, 0.0  ;;  %v2185_v28 = vpack.c.bf16 %v1550_v24, %v1549_v26 }
 0xa31   : > { %v1552_v11 = vadd.f32 %v1548_v27, %v1426_v4 }
 0xa32   : > { %v1551_v29 = vadd.f32 %v1547_v9, %v1425_v5  ;;  %2186 = vmatprep.subr.bf16.mxu1 %v2185_v28 }
 0xa33   : > { %2188 = vmatpush3.bf16.msra.mxu1 %v2185_v28 }
 0xa34   : > { %v2189_v30 = vpack.c.bf16 %v1552_v11, %v1551_v29 }
 0xa36   : > { %2190 = vmatprep.subr.bf16.mxu1 %v2189_v30 }
 0xa37   : > { %2192 = vmatpush3.bf16.msra.mxu1 %v2189_v30 }
 0xa3a   : > { %2092 = vmatmul.mubr.msk.f32.vlgmr.msra.gmra.mrb[20].mxu1 %vm235_vm0, %v1555_v31 }
 0xa3b   : > { %2094 = vmatprep.mubr.msk.f32.mxu1 %vm235_vm0, %v1556_v32 }
 0xa3e   : > { %2095 = vmatmul.mubr.msk.f32.gmra.mrb[22].mxu1 %vm235_vm0, %v1557_v33 }
 0xb0d   : > { %v2093_v36 = vpop.f32.mrb[20].mxu1 }
 0xb0e   : > { %v1658_v38 = vadd.f32 %v2093_v36, %v1564_v35  ;;  %v1652_v40 = vpop.f32.mrb[21].mxu1 }
 0xb0f   : > { %v1653_v41 = vadd.f32 %v1652_v40, %v1560_v34 }
 0xb10   : > { %1672 = vst [vmem:[%s202_s7 + $0x8] sm:$0xff] %v1658_v38 }
 0xb11   : > { %1671 = vst [vmem:[%s202_s7] sm:$0xff] %v1653_v41  ;;  %v2096_v43 = vpop.f32.mrb[22].mxu1 }
 0xb12   : > { %v1668_v47 = vadd.f32 %v2096_v43, %v1572_v42  ;;  %v1662_v48 = vpop.f32.mrb[23].mxu1 }
 0xb13   : > { %v1663_v49 = vadd.f32 %v1662_v48, %v1568_v45 }
 0xb14   : > { %1674 = vst [vmem:[%s202_s7 + $0x18] sm:$0xff] %v1668_v47 }
 0xb15   : > { %1673 = vst [vmem:[%s202_s7 + $0x10] sm:$0xff] %v1663_v49 }
 0xb16   : > { %2373 = shalt.err (!%p2370_p11)
}
 0xb17   : > { %s2374_s26 = scalar_lea.hbm %s2760_s10, 512  ;;  %s2378_s29 = scalar_lea.hbm %s2807_s3, 1024 }
 0xb18   : > { %p2375_p13 = scmp.ne.s32.totalorder %s2760_s10, %s2374_s26  ;;  %p2379_p12 = scmp.lt.u32.totalorder %s2760_s10, %s2807_s3 }
 0xb19   : > { %p2380_p3 = scmp.lt.u32.totalorder %s2378_s29, %s2374_s26  ;;  %p2382_p8 = scmp.lt.u32.totalorder %s2374_s26, %s2760_s10 }
 0xb1a   : > { %p2376_p2 = pnand %p2375_p13, %p2825_p9 }
 0xb1b   : > { %p2381_p7 = por %p2380_p3, %p2379_p12 }
 0xb1c   : > { %p2377_p6 = pneg %p2376_p2 }
 0xb1d   : > { %p2383_p10 = por %p2382_p8, %p2381_p7 }
 0xb1f   : > { %p2384_p1 = pnand %p2383_p10, %p2377_p6 }
 0xb21   : > { %2387 = shalt.err (!%p2384_p1)
}
 0xb22   : > { %s2448_s6 = smov 128   ;;  %s2449_s7 = smov 256  }
 0xb23   : > { %s2450_s5 = smov 8  }
 0xb24   : > { %2199 = dma.vmem_to_hbm [thread:$0]  (%p2825_p9), %s2755_s30, 512, %s2760_s10, %s1676_s16, %s2448_s6, %s2449_s7, %s2450_s5  }
 0xb25 PF: > { %s1703_s8 = sand.u32 1, %s2418_s12   ;;  %p2826_p4 = scmp.ne.s32.totalorder %s2815_s25, 0 }
 0xb26   : > { %p2827_p0 = scmp.ge.s32.totalorder %s2430_s15, 2  ;;  %s1704_s28 = scalar_lea.sflag [#allocation4], %s1703_s8 }
 0xb28   : > { %p2210_p5 = pnand %p2827_p0, %p2826_p4 }
 0xb2a   : > { %2413 = dma.done.wait (!%p2210_p5), %s1704_s28, 512  }
 0xb2b   : > { %2415 = vsyncadd (!%p2210_p5), %s1704_s28, 4294966784  ;;  %p17_p11 = scmp.ge.s32.totalorder %s2496_s18, 4   ;;  %s2828_s12 = smov %s2422_s13 }
 0xb2c   : > { %s2829_s13 = smov %s2426_s14  ;;  %s2830_s14 = smov %s2508_s21 }
 0xb2d   : > { %s2831_s15 = smov %s2496_s18  ;;  %19 = sbr.rel (!%p17_p11) target bundleno = 6 (0x6), region = 92 }
 0xb34   :  { %1709 = vsyncpa [#allocation3], 1 }
 0xb35   :  { %1711 = vsyncpa [#allocation3 + $0x1], 1 }
 0xb36   :  { %1712 = vsyncpa [#allocation6], 1 }
 0xb37   :  { %1713 = vsyncpa [#allocation4], 1 }
 0xb38   :  { %1715 = vsyncpa [#allocation4 + $0x1], 1 }

</bundles_post_ra>
